<compile_context>
chip_gen: v7x
topology: tpu7x:2x2x1
jax: 0.10.0
libtpu: 0.0.40
codegen_flags: <defaults>
</compile_context>

<pallas_src>
import math

import jax
import jax.numpy as jnp
from jax.experimental import pallas as pl
from jax.experimental.pallas import tpu as pltpu


def _im2col(x_pad, K, Hout, Wout):
    """(N, Cin, Hp, Wp) -> (N, Cin*K*K, Hout*Wout), row order (cin, kh, kw).

    Matches the flattening of an OIHW weight reshaped to (Cout, Cin*K*K).
    """
    N, Cin = x_pad.shape[:2]
    cols = []
    for kh in range(K):
        for kw in range(K):
            cols.append(x_pad[:, :, kh:kh + Hout, kw:kw + Wout])  # (N,Cin,Hout,Wout)
    pat = jnp.stack(cols, axis=2)                                 # (N,Cin,K*K,Hout,Wout)
    return pat.reshape(N, Cin * K * K, Hout * Wout)


def _triplane_conv_kernel(p_ref, w_ref, o_ref):
    # p_ref: (1, KKCp, B*HW)   w_ref: (1, Cout, KKCp)   o_ref: (1, Cout, B*HW)
    # Bias is already folded into w (extra column) / patches (ones row), so the
    # whole plane is one MXU matmul with f32 accumulation.
    acc = jnp.dot(w_ref[0], p_ref[0], preferred_element_type=jnp.float32)
    o_ref[0] = acc.astype(o_ref.dtype)


def triplane_conv_forward(featmaps, params, padding,
                          compute_dtype=jnp.bfloat16,
                          out_dtype=jnp.float32):
    """Mirrors TriplaneConv.forward (is_rollout=True).

    featmaps: (B, 3, C, R, R)  ->  (B, 3, Cout, R', R')
    compute_dtype: bf16 by default (MXU-native on v5e/v6e/v7x; accumulation is
                   f32). Use jnp.float32 for strict numerics.
    out_dtype:     f32 by default; set to bf16 if downstream consumes bf16 to
                   halve output writeback bytes.
    """
    B, nplanes, C, R, R2 = featmaps.shape
    assert nplanes == 3 and R == R2

    tpl_xy, tpl_yz, tpl_xz = featmaps[:, 0], featmaps[:, 1], featmaps[:, 2]

    # Cross-plane mean "rollout" augmentation (cheap reductions; plain JAX glue).
    m_yz_d = jnp.mean(tpl_yz, axis=-1, keepdims=True)   # (B,C,W,1)
    m_xz_d = jnp.mean(tpl_xz, axis=-1, keepdims=True)   # (B,C,H,1)
    m_xy_h = jnp.mean(tpl_xy, axis=-2, keepdims=True)   # (B,C,1,W)
    m_xz_h = jnp.mean(tpl_xz, axis=-2, keepdims=True)   # (B,C,1,D)
    m_xy_w = jnp.mean(tpl_xy, axis=-1, keepdims=True)   # (B,C,H,1)
    m_yz_w = jnp.mean(tpl_yz, axis=-2, keepdims=True)   # (B,C,1,D)

    tpl_xy_h = jnp.concatenate(
        [tpl_xy,
         jnp.broadcast_to(jnp.swapaxes(m_yz_d, -1, -2), tpl_xy.shape),
         jnp.broadcast_to(m_xz_d, tpl_xy.shape)], axis=1)
    tpl_yz_h = jnp.concatenate(
        [tpl_yz,
         jnp.broadcast_to(jnp.swapaxes(m_xy_h, -1, -2), tpl_yz.shape),
         jnp.broadcast_to(m_xz_h, tpl_yz.shape)], axis=1)
    tpl_xz_h = jnp.concatenate(
        [tpl_xz,
         jnp.broadcast_to(m_xy_w, tpl_xz.shape),
         jnp.broadcast_to(m_yz_w, tpl_xz.shape)], axis=1)

    Cout, Cin, K, _ = params["w_xy"].shape
    assert Cin == 3 * C
    Hout = R + 2 * padding - K + 1
    Wout = Hout
    HW = Hout * Wout
    BHW = B * HW
    KKC = Cin * K * K
    # Pad the contraction dim to a multiple of 128, reserving one row for the
    # folded bias (ones row in patches / bias column in weights).
    KKCp = ((KKC + 1 + 127) // 128) * 128

    # NOTE: BHW = 512 here, a multiple of 128 -> unmasked lane-dense stores.
    # Other R values stay correct but silently fall back to masked vst.

    # Stack planes -> (B*3, Cin, R, R), pad, im2col.
    aug = jnp.stack([tpl_xy_h, tpl_yz_h, tpl_xz_h], axis=1).reshape(B * 3, Cin, R, R)
    aug_pad = jnp.pad(aug, ((0, 0), (0, 0), (padding, padding), (padding, padding)))
    patches = _im2col(aug_pad, K, Hout, Wout)                    # (B*3, KKC, HW)

    # Fold batch into the lane (N) axis: (3, KKC, B*HW).
    patches = patches.reshape(B, 3, KKC, HW).transpose(1, 2, 0, 3).reshape(3, KKC, BHW)
    ones_row = jnp.ones((3, 1, BHW), patches.dtype)              # bias row
    zero_rows = jnp.zeros((3, KKCp - KKC - 1, BHW), patches.dtype)
    patches = jnp.concatenate([patches, ones_row, zero_rows], axis=1)  # (3, KKCp, BHW)

    # Weights flattened to (3, Cout, KKCp) with the bias as column KKC.
    w = jnp.stack([params["w_xy"], params["w_yz"], params["w_xz"]], axis=0)
    w = w.reshape(3, Cout, KKC)
    b = jnp.stack([params["b_xy"], params["b_yz"], params["b_xz"]], axis=0)
    b = b.reshape(3, Cout, 1)
    zero_cols = jnp.zeros((3, Cout, KKCp - KKC - 1), w.dtype)
    w = jnp.concatenate([w, b, zero_cols], axis=-1)              # (3, Cout, KKCp)

    patches = patches.astype(compute_dtype)
    w = w.astype(compute_dtype)

    out_flat = pl.pallas_call(
        _triplane_conv_kernel,
        out_shape=jax.ShapeDtypeStruct((3, Cout, BHW), out_dtype),
        grid_spec=pltpu.PrefetchScalarGridSpec(
            num_scalar_prefetch=0,
            grid=(3,),
            in_specs=[
                pl.BlockSpec((1, KKCp, BHW), lambda p: (p, 0, 0)),
                pl.BlockSpec((1, Cout, KKCp), lambda p: (p, 0, 0)),
            ],
            out_specs=pl.BlockSpec((1, Cout, BHW), lambda p: (p, 0, 0)),
        ),
        compiler_params=pltpu.CompilerParams(
            dimension_semantics=("parallel",)),
    )(patches, w)

    # (3, Cout, B*HW) -> (B, 3, Cout, Hout, Wout)
    out = out_flat.reshape(3, Cout, B, Hout, Wout).transpose(2, 0, 1, 3, 4)
    return out


def init_triplane_conv_params(key, channels, out_channels, kernel_size,
                              is_rollout=True):
    """Deterministic parameter init matching nn.Conv2d default shapes/bounds."""
    in_channels = channels * 3 if is_rollout else channels
    fan_in = in_channels * kernel_size * kernel_size
    bound = 1.0 / math.sqrt(fan_in)
    keys = jax.random.split(key, 6)
    shape_w = (out_channels, in_channels, kernel_size, kernel_size)

    def u(k, shape):
        return jax.random.uniform(k, shape, jnp.float32, -bound, bound)

    return {
        "w_xy": u(keys[0], shape_w), "b_xy": u(keys[1], (out_channels,)),
        "w_yz": u(keys[2], shape_w), "b_yz": u(keys[3], (out_channels,)),
        "w_xz": u(keys[4], shape_w), "b_xz": u(keys[5], (out_channels,)),
    }


def _reference_conv2d(x_nchw, w_oihw, bias, padding):
    out = jax.lax.conv_general_dilated(
        x_nchw, w_oihw, window_strides=(1, 1),
        padding=[(padding, padding), (padding, padding)],
        dimension_numbers=("NCHW", "OIHW", "NCHW"))
    return out + bias.reshape(1, -1, 1, 1)


def _reference_forward(featmaps, params, padding):
    tpl_xy, tpl_yz, tpl_xz = featmaps[:, 0], featmaps[:, 1], featmaps[:, 2]
    m_yz_d = jnp.mean(tpl_yz, axis=-1, keepdims=True)
    m_xz_d = jnp.mean(tpl_xz, axis=-1, keepdims=True)
    m_xy_h = jnp.mean(tpl_xy, axis=-2, keepdims=True)
    m_xz_h = jnp.mean(tpl_xz, axis=-2, keepdims=True)
    m_xy_w = jnp.mean(tpl_xy, axis=-1, keepdims=True)
    m_yz_w = jnp.mean(tpl_yz, axis=-2, keepdims=True)
    xy_h = jnp.concatenate(
        [tpl_xy, jnp.broadcast_to(jnp.swapaxes(m_yz_d, -1, -2), tpl_xy.shape),
         jnp.broadcast_to(m_xz_d, tpl_xy.shape)], axis=1)
    yz_h = jnp.concatenate(
        [tpl_yz, jnp.broadcast_to(jnp.swapaxes(m_xy_h, -1, -2), tpl_yz.shape),
         jnp.broadcast_to(m_xz_h, tpl_yz.shape)], axis=1)
    xz_h = jnp.concatenate(
        [tpl_xz, jnp.broadcast_to(m_xy_w, tpl_xz.shape),
         jnp.broadcast_to(m_yz_w, tpl_xz.shape)], axis=1)
    return jnp.stack([
        _reference_conv2d(xy_h, params["w_xy"], params["b_xy"], padding),
        _reference_conv2d(yz_h, params["w_yz"], params["b_yz"], padding),
        _reference_conv2d(xz_h, params["w_xz"], params["b_xz"], padding)], axis=1)


if __name__ == "__main__":
    # Small shapes consistent with the module: B=2, C=4, R=16 (H=W=D), Cout=8.
    B, C, R = 2, 4, 16
    out_channels, kernel_size, padding = 8, 3, 1

    key = jax.random.PRNGKey(0)
    k_x, k_p = jax.random.split(key)
    featmaps = jax.random.normal(k_x, (B, 3, C, R, R), jnp.float32)
    params = init_triplane_conv_params(k_p, C, out_channels, kernel_size)

    ref = _reference_forward(featmaps, params, padding)

    # Default (bf16 operands, f32 accumulation) — the v5e/v6e/v7x throughput path.
    out_bf16 = triplane_conv_forward(featmaps, params, padding)
    out_bf16 = jax.block_until_ready(out_bf16)
    assert out_bf16.shape == (B, 3, out_channels, R, R), out_bf16.shape
    err_bf16 = float(jnp.max(jnp.abs(out_bf16 - ref)))
    assert jnp.allclose(out_bf16, ref, rtol=5e-2, atol=5e-2), err_bf16

    # Strict-numerics path (f32 operands) against lax.conv.
    out_f32 = triplane_conv_forward(featmaps, params, padding,
                                    compute_dtype=jnp.float32)
    out_f32 = jax.block_until_ready(out_f32)
    err_f32 = float(jnp.max(jnp.abs(out_f32 - ref)))
    assert jnp.allclose(out_f32, ref, rtol=5e-4, atol=5e-4), err_f32

    print("KERNEL_OK")
</pallas_src>

<mosaic_0001>
module attributes {stable_mosaic.version = 11 : i64} {
  func.func @_triplane_conv_kernel(%arg0: i32, %arg1: memref<1x128x512xbf16, #tpu.memory_space<vmem>>, %arg2: memref<1x8x128xbf16, #tpu.memory_space<vmem>>, %arg3: memref<1x8x512xf32, #tpu.memory_space<vmem>>) attributes {dimension_semantics = [#tpu.dimension_semantics<parallel>], iteration_bounds = array<i64: 3>, scalar_prefetch = 0 : i64, scratch_operands = 0 : i64, tpu.core_type = #tpu.core_type<tc>, window_params = [{transform_indices = @transform_0, window_bounds = array<i64: 1, 128, 512>}, {transform_indices = @transform_1, window_bounds = array<i64: 1, 8, 128>}, {transform_indices = @transform_2, window_bounds = array<i64: 1, 8, 512>}]} {
    %c0 = arith.constant 0 : index
    %c0_0 = arith.constant 0 : index
    %c0_1 = arith.constant 0 : index
    %0 = vector.load %arg2[%c0, %c0_0, %c0_1] : memref<1x8x128xbf16, #tpu.memory_space<vmem>>, vector<1x8x128xbf16>
    %1 = vector.shape_cast %0 : vector<1x8x128xbf16> to vector<8x128xbf16>
    %c0_2 = arith.constant 0 : index
    %c0_3 = arith.constant 0 : index
    %c0_4 = arith.constant 0 : index
    %2 = vector.load %arg1[%c0_2, %c0_3, %c0_4] : memref<1x128x512xbf16, #tpu.memory_space<vmem>>, vector<1x128x512xbf16>
    %3 = vector.shape_cast %2 : vector<1x128x512xbf16> to vector<128x512xbf16>
    %cst = arith.constant dense<0.000000e+00> : vector<8x512xf32>
    %4 = tpu.matmul %1, %3, %cst {dimension_numbers = #tpu.dot_dimension_numbers<[1], [0], [0], [1], [0, 0, 1, 1], [], []>} : vector<8x128xbf16>, vector<128x512xbf16>, vector<8x512xf32> -> vector<8x512xf32>
    %c0_5 = arith.constant 0 : index
    %c0_6 = arith.constant 0 : index
    %c0_7 = arith.constant 0 : index
    %5 = vector.load %arg3[%c0_5, %c0_6, %c0_7] : memref<1x8x512xf32, #tpu.memory_space<vmem>>, vector<1x8x512xf32>
    %6 = vector.shape_cast %5 : vector<1x8x512xf32> to vector<8x512xf32>
    %7 = vector.shape_cast %4 : vector<8x512xf32> to vector<1x8x512xf32>
    tpu.vector_store %arg3[%c0_5, %c0_6, %c0_7], %7 {strides = array<i32>} : memref<1x8x512xf32, #tpu.memory_space<vmem>>, vector<1x8x512xf32>,
    return
  }
  func.func @transform_0(%arg0: i32) -> (i32, i32, i32) {
    %c0_i32 = arith.constant 0 : i32
    %c0_i32_0 = arith.constant 0 : i32
    %c0_i32_1 = arith.constant 0 : i32
    return %arg0, %c0_i32, %c0_i32_0 : i32, i32, i32
  }
  func.func @transform_1(%arg0: i32) -> (i32, i32, i32) {
    %c0_i32 = arith.constant 0 : i32
    %c0_i32_0 = arith.constant 0 : i32
    %c0_i32_1 = arith.constant 0 : i32
    return %arg0, %c0_i32, %c0_i32_0 : i32, i32, i32
  }
  func.func @transform_2(%arg0: i32) -> (i32, i32, i32) {
    %c0_i32 = arith.constant 0 : i32
    %c0_i32_0 = arith.constant 0 : i32
    %c0_i32_1 = arith.constant 0 : i32
    return %arg0, %c0_i32, %c0_i32_0 : i32, i32, i32
  }
}

</mosaic_0001>

<bundles_post_ra>
// kernel: tpu_custom_call.1
= control target key start
LH: loop header
LB: loop body
LE: loop exit
PB: predicated region body
PF: predicated region fallthrough
CT: control target
= control target key end

     0   :  { %7 = vsyncpa [#allocation3], 0  ;;  %s1131_s0 = inlined_call_operand.hbm [shape: bf16[3,128,512], index: 0, kind: input, shape index: {}]   ;;  %s1132_s1 = inlined_call_operand.hbm [shape: bf16[3,8,128], index: 1, kind: input, shape index: {}]   ;;  %s1133_s2 = inlined_call_operand.hbm [shape: f32[3,8,512], index: 2, kind: output, shape index: {}]  }
   0x1   :  { %9 = vsyncpa [#allocation3 + $0x1], 0 }
   0x2   :  { %10 = vsyncpa [#allocation6], 0 }
   0x3   :  { %12 = vsyncpa [#allocation6 + $0x1], 0 }
   0x4   :  { %13 = vsyncpa [#allocation4], 0 }
   0x5   :  { %15 = vsyncpa [#allocation4 + $0x1], 0  ;;  %s893_s9 = smov 0   ;;  %s895_s10 = smov 0  }
   0x6   :  { %s897_s11 = smov 0   ;;  %s899_s12 = smov 0  }
   0x7 LB: > { %s914_s13 = sadd.s32 4294967295, %s870_s12   ;;  %s587_s14 = sadd.s32 4294967294, %s870_s12   ;;  %s870_s12 = sphi %s899_s12, %s1149_s12   ;;  %s866_s11 = sphi %s897_s11, %s1148_s11   ;;  %s862_s10 = sphi %s895_s10, %s1147_s10   ;;  %s858_s9 = sphi %s893_s9, %s1146_s9  }
   0x8   : > { %s918_s15 = sadd.s32 1, %s870_s12   ;;  %s28_s16 = sadd.s32 1, %s866_s11 }
   0x9   : > { %s25_s17 = ssub.s32 %s870_s12, %s918_s15  ;;  %p35_p0 = scmp.ne.s32.totalorder %s866_s11, %s862_s10 }
   0xa   : > { %p26_p1 = scmp.eq.s32.totalorder %s25_s17, 0  ;;  %p36_p2 = scmp.eq.s32.totalorder %s870_s12, 0 }
   0xb   : > { %p41_p3 = scmp.ne.s32.totalorder %s862_s10, %s858_s9  ;;  %p42_p4 = scmp.eq.s32.totalorder %s914_s13, 0 }
   0xc   : > { %s930_s18 = scalar_select %p26_p1, %s866_s11, %s28_s16  }
   0xd   : > { %p932_p5 = por %p36_p2, %p35_p0  ;;  %p936_p6 = por %p42_p4, %p41_p3 }
   0xe   : > { %p91_p7 = scmp.eq.s32.totalorder %s914_s13, 2  ;;  %p97_p8 = scmp.eq.s32.totalorder %s587_s14, 2 }
   0xf   : > { %s1137_s20 = scalar_select %p936_p6, 1, 0 }
  0x10   : > { %p655_p9 = scmp.lt.s32.totalorder %s870_s12, 3  ;;  %p942_p10 = por %p91_p7, %p35_p0 }
  0x11   : > { %p946_p11 = por %p97_p8, %p41_p3  ;;  %s951_s23 = sand.u32 1, %s866_s11  }
  0x12   : > { %s1138_s21 = scalar_select %p942_p10, 1, 0 }
  0x13   : > { %s1139_s22 = scalar_select %p946_p11, 1, 0 }
  0x14   : > { %s636_s24 = sshll.u32 %s870_s12, 12  ;;  %s590_s25 = sshll.u32 %s951_s23, 8 }
  0x15   : > { %s958_s28 = scalar_lea.hbm %s1131_s0, %s636_s24  ;;  %s121_s29 = scalar_lea.vmem [#allocation2], %s590_s25 }
  0x16   : > { %s128_s30 = sshll.u32 %s121_s29, 4  ;;  %p962_p12 = pnand %p655_p9, %p932_p5  ;;  %s966_s30 = int_to_ptr.vmem [resolvable:$true] %s128_s30 }
  0x17   : > { %s118_s4 = scalar_lea.sflag [#allocation3], %s951_s23  ;;  %s740_s5 = scalar_lea.hbm %s958_s28, 4096 }
  0x18   : > { %p741_p13 = scmp.ne.s32.totalorder %s958_s28, %s740_s5  ;;  %p742_p0 = pneg %p962_p12 }
  0x19   : > { %s745_s8 = scalar_lea.hbm %s1131_s0, 12288  ;;  %p746_p3 = scmp.lt.u32.totalorder %s958_s28, %s1131_s0 }
  0x1a   : > { %p743_p1 = pnand %p742_p0, %p741_p13  ;;  %p747_p4 = scmp.lt.u32.totalorder %s745_s8, %s740_s5 }
  0x1b   : > { %p749_p7 = scmp.lt.u32.totalorder %s740_s5, %s958_s28 }
  0x1c   : > { %p744_p2 = pneg %p743_p1  ;;  %p748_p5 = por %p747_p4, %p746_p3 }
  0x1e   : > { %p750_p8 = por %p749_p7, %p748_p5 }
  0x20   : > { %p751_p9 = pnand %p750_p8, %p744_p2 }
  0x22   : > { %754 = shalt.err (!%p751_p9)
}
  0x23   : > { %s755_s17 = scalar_lea.vmem %s966_s30, 4096  ;;  %s872_s19 = smov [#allocation2]  }
  0x24   : > { %p756_p13 = scmp.ne.s32.totalorder %s966_s30, %s755_s17  ;;  %s760_s24 = sshll.u32 %s872_s19, 4  ;;  %s761_s24 = int_to_ptr.vmem [resolvable:$false] %s760_s24 }
  0x25   : > { %s762_s25 = scalar_lea.vmem %s761_s24, 8192  ;;  %p763_p10 = scmp.lt.s32.totalorder %s966_s30, %s761_s24 }
  0x26   : > { %p758_p1 = pnand %p756_p13, %p742_p0  ;;  %p764_p3 = scmp.lt.s32.totalorder %s762_s25, %s755_s17 }
  0x28   : > { %p759_p11 = pneg %p758_p1  ;;  %p765_p4 = por %p764_p3, %p763_p10 }
  0x2a   : > { %p766_p5 = pnand %p765_p4, %p759_p11 }
  0x2c   : > { %769 = shalt.err (!%p766_p5)
}
  0x2d   : > { %s873_s26 = smov 256   ;;  %s874_s27 = smov 16  }
  0x2e   : > { %647 = dma.hbm_to_vmem [thread:$0]  (!%p962_p12), %s958_s28, 4096, %s966_s30, %s118_s4, %s873_s26, %s873_s26, %s874_s27  }
  0x2f   : > { %p595_p2 = scmp.ge.s32.totalorder %s870_s12, 1  ;;  %p154_p7 = scmp.lt.s32.totalorder %s870_s12, 4 }
  0x30   : > { %s593_s29 = sshll.u32 %s951_s23, 2  ;;  %s594_s6 = sshll.u32 %s870_s12, 6 }
  0x31   : > { %p999_p10 = pnand %p595_p2, %p154_p7  ;;  %s142_s7 = scalar_lea.vmem [#allocation5], %s593_s29 }
  0x32   : > { %s149_s8 = sshll.u32 %s142_s7, 4  ;;  %s1007_s17 = scalar_lea.hbm %s1132_s1, %s594_s6  ;;  %s150_s8 = int_to_ptr.vmem [resolvable:$true] %s149_s8 }
  0x33   : > { %s1141_s5 = scalar_select %p999_p10, 1, 0 }
  0x34   : > { %s139_s28 = scalar_lea.sflag [#allocation6], %s951_s23  ;;  %s770_s30 = scalar_lea.hbm %s1007_s17, 64 }
  0x35   : > { %p771_p11 = scmp.ne.s32.totalorder %s1007_s17, %s770_s30  ;;  %s775_s24 = scalar_lea.hbm %s1132_s1, 192 }
  0x36   : > { %p776_p13 = scmp.lt.u32.totalorder %s1007_s17, %s1132_s1  ;;  %p777_p1 = scmp.lt.u32.totalorder %s775_s24, %s770_s30 }
  0x37   : > { %p773_p8 = pnand %p771_p11, %p742_p0  ;;  %p779_p4 = scmp.lt.u32.totalorder %s770_s30, %s1007_s17 }
  0x38   : > { %p778_p3 = por %p777_p1, %p776_p13 }
  0x39   : > { %p774_p9 = pneg %p773_p8 }
  0x3a   : > { %p780_p5 = por %p779_p4, %p778_p3 }
  0x3c   : > { %p781_p2 = pnand %p780_p5, %p774_p9 }
  0x3e   : > { %784 = shalt.err (!%p781_p2)
}
  0x3f   : > { %s785_s23 = scalar_lea.vmem %s150_s8, 64  ;;  %s875_s27 = smov [#allocation5]  }
  0x40   : > { %p786_p7 = scmp.ne.s32.totalorder %s150_s8, %s785_s23  ;;  %s790_s29 = sshll.u32 %s875_s27, 4  ;;  %s791_s29 = int_to_ptr.vmem [resolvable:$false] %s790_s29 }
  0x41   : > { %s792_s6 = scalar_lea.vmem %s791_s29, 128  ;;  %p793_p6 = scmp.lt.s32.totalorder %s150_s8, %s791_s29 }
  0x42   : > { %p788_p11 = pnand %p786_p7, %p742_p0  ;;  %p794_p10 = scmp.lt.s32.totalorder %s792_s6, %s785_s23 }
  0x44   : > { %p789_p8 = pneg %p788_p11  ;;  %p795_p1 = por %p794_p10, %p793_p6 }
  0x46   : > { %p796_p13 = pnand %p795_p1, %p789_p8 }
  0x48   : > { %799 = shalt.err (!%p796_p13)
}
  0x49   : > { %650 = dma.hbm_to_vmem [thread:$0]  (!%p962_p12), %s1007_s17, 64, %s150_s8, %s139_s28  }
  0x4a   : > { %p1142_p9 = scmp.ne.s32.totalorder %s1141_s5, 0 }
  0x4b   : > { %s1032_s7 = sand.u32 (!%p1142_p9), 1, %s862_s10   ;;  %p1143_p6 = scmp.ne.s32.totalorder (!%p1142_p9), %s1137_s20, 0 }
  0x4c   : > { %158 = sbr.rel (%p1142_p9) target bundleno = 349 (0x15d), region = 28  ;;  %s596_s14 = sshll.u32 (!%p1142_p9), %s1032_s7, 8 }
  0x4d   : > { %s161_s16 = scalar_lea.sflag (!%p1142_p9), [#allocation3], %s1032_s7  ;;  %s1036_s30 = scalar_lea.vmem (!%p1142_p9), [#allocation2], %s596_s14 }
  0x53   : > { %845 = dma.done.wait (%p1143_p6), %s161_s16, 4096  }
  0x54   : > { %847 = vsyncadd (%p1143_p6), %s161_s16, 4294963200  ;;  %s597_s3 = sshll.u32 %s1032_s7, 2  ;;  %s170_s5 = scalar_lea.sflag [#allocation6], %s1032_s7 }
  0x55   : > { %s1044_s8 = scalar_lea.vmem [#allocation5], %s597_s3 }
  0x56   : > { %849 = dma.done.wait (%p1143_p6), %s170_s5, 64  }
  0x57   : > { %851 = vsyncadd (%p1143_p6), %s170_s5, 4294967232  ;;  %v876_v0 = vmov 0   ;;  %v692_v1 = vld [vmem:[%s1036_s30 + $0x4] ss:$16 sps:$4 sm:$0xff]   ;;  %v694_v2 = vld [vmem:[%s1036_s30 + $0xc] ss:$16 sps:$4 sm:$0xff]  }
  0x58   : > { %425 = vmatprep.mubr.bf16.mxu0 %v876_v0  ;;  %466 = vmatprep.mubr.bf16.mxu1 %v876_v0  ;;  %v696_v3 = vld [vmem:[%s1036_s30] ss:$16 sps:$4 sm:$0xff]   ;;  %v697_v4 = vld [vmem:[%s1036_s30 + $0x8] ss:$16 sps:$4 sm:$0xff]   ;;  %v698_v5 = vld [vmem:[%s1036_s30 + $0x24] ss:$16 sps:$4 sm:$0xff]  }
  0x59   : > { %393 = vmatprep.subr.bf16.mxu0 %v692_v1  ;;  %434 = vmatprep.subr.bf16.mxu1 %v694_v2  ;;  %v700_v6 = vld [vmem:[%s1036_s30 + $0x2c] ss:$16 sps:$4 sm:$0xff]   ;;  %v702_v7 = vld [vmem:[%s1036_s30 + $0x20] ss:$16 sps:$4 sm:$0xff]   ;;  %v703_v8 = vld [vmem:[%s1036_s30 + $0x28] ss:$16 sps:$4 sm:$0xff]  }
  0x5a   : > { %394 = vmatpush1.bf16.msra.mxu0 %v696_v3  ;;  %435 = vmatpush1.bf16.msra.mxu1 %v697_v4  ;;  %v704_v9 = vld [vmem:[%s1036_s30 + $0x44] ss:$16 sps:$4 sm:$0xff]   ;;  %v706_v10 = vld [vmem:[%s1036_s30 + $0x4c] ss:$16 sps:$4 sm:$0xff]   ;;  %v708_v11 = vld [vmem:[%s1036_s30 + $0x40] ss:$16 sps:$4 sm:$0xff]  }
  0x5b   : > { %395 = vmatprep.subr.bf16.mxu0 %v698_v5  ;;  %436 = vmatprep.subr.bf16.mxu1 %v700_v6  ;;  %v709_v12 = vld [vmem:[%s1036_s30 + $0x48] ss:$16 sps:$4 sm:$0xff]   ;;  %v710_v13 = vld [vmem:[%s1036_s30 + $0x64] ss:$16 sps:$4 sm:$0xff]   ;;  %v712_v14 = vld [vmem:[%s1036_s30 + $0x6c] ss:$16 sps:$4 sm:$0xff]  }
  0x5c   : > { %v714_v15 = vld [vmem:[%s1036_s30 + $0x60] ss:$16 sps:$4 sm:$0xff]   ;;  %v715_v16 = vld [vmem:[%s1036_s30 + $0x68] ss:$16 sps:$4 sm:$0xff]   ;;  %v716_v17 = vld [vmem:[%s1036_s30 + $0x84] ss:$16 sps:$4 sm:$0xff]  }
  0x5d   : > { %v718_v18 = vld [vmem:[%s1036_s30 + $0x8c] ss:$16 sps:$4 sm:$0xff]   ;;  %v720_v19 = vld [vmem:[%s1036_s30 + $0x80] ss:$16 sps:$4 sm:$0xff]   ;;  %v721_v20 = vld [vmem:[%s1036_s30 + $0x88] ss:$16 sps:$4 sm:$0xff]  }
  0x5e   : > { %396 = vmatpush1.bf16.msra.mxu0 %v702_v7  ;;  %437 = vmatpush1.bf16.msra.mxu1 %v703_v8  ;;  %v722_v21 = vld [vmem:[%s1036_s30 + $0xa4] ss:$16 sps:$4 sm:$0xff]   ;;  %v724_v22 = vld [vmem:[%s1036_s30 + $0xac] ss:$16 sps:$4 sm:$0xff]   ;;  %v726_v23 = vld [vmem:[%s1036_s30 + $0xa0] ss:$16 sps:$4 sm:$0xff]  }
  0x5f   : > { %397 = vmatprep.subr.bf16.mxu0 %v704_v9  ;;  %438 = vmatprep.subr.bf16.mxu1 %v706_v10  ;;  %v727_v24 = vld [vmem:[%s1036_s30 + $0xa8] ss:$16 sps:$4 sm:$0xff]   ;;  %v728_v25 = vld [vmem:[%s1036_s30 + $0xc4] ss:$16 sps:$4 sm:$0xff]   ;;  %v730_v26 = vld [vmem:[%s1036_s30 + $0xcc] ss:$16 sps:$4 sm:$0xff]  }
  0x60   : > { %v732_v27 = vld [vmem:[%s1036_s30 + $0xc0] ss:$16 sps:$4 sm:$0xff]   ;;  %v733_v28 = vld [vmem:[%s1036_s30 + $0xc8] ss:$16 sps:$4 sm:$0xff]   ;;  %v734_v29 = vld [vmem:[%s1036_s30 + $0xe4] ss:$16 sps:$4 sm:$0xff]  }
  0x61   : > { %v736_v30 = vld [vmem:[%s1036_s30 + $0xec] ss:$16 sps:$4 sm:$0xff]   ;;  %v738_v31 = vld [vmem:[%s1036_s30 + $0xe0] ss:$16 sps:$4 sm:$0xff]   ;;  %v739_v32 = vld [vmem:[%s1036_s30 + $0xe8] ss:$16 sps:$4 sm:$0xff]  }
  0x62   : > { %398 = vmatpush1.bf16.msra.mxu0 %v708_v11  ;;  %439 = vmatpush1.bf16.msra.mxu1 %v709_v12  ;;  %v200_v33 = vld [vmem:[%s1044_s8] sm:$0xf]  ;;  %s598_s20 = sshll.u32 %s1032_s7, 5  ;;  %s637_s4 = sshll.u32 %s914_s13, 9 }
  0x63   : > { %399 = vmatprep.subr.bf16.mxu0 %v710_v13  ;;  %440 = vmatprep.subr.bf16.mxu1 %v712_v14  ;;  %s198_s17 = scalar_lea.vmem [#allocation7], %s598_s20  ;;  %s1090_s25 = scalar_lea.hbm %s1133_s2, %s637_s4 }
  0x64   : > { %s494_s28 = sshll.u32 %s198_s17, 4  ;;  %s480_s13 = scalar_lea.sflag [#allocation4], %s1032_s7  ;;  %s1085_s28 = int_to_ptr.vmem [resolvable:$true] %s494_s28 }
  0x65   : > { %s800_s26 = scalar_lea.vmem %s1085_s28, 512  ;;  %p1144_p0 = scmp.ne.s32.totalorder %s1138_s21, 0 }
  0x66   : > { %400 = vmatpush1.bf16.msra.mxu0 %v714_v15  ;;  %441 = vmatpush1.bf16.msra.mxu1 %v715_v16  ;;  %p801_p12 = scmp.ne.s32.totalorder %s1085_s28, %s800_s26  ;;  %s877_s23 = smov [#allocation7]  }
  0x67   : > { %401 = vmatprep.subr.bf16.mxu0 %v716_v17  ;;  %442 = vmatprep.subr.bf16.mxu1 %v718_v18  ;;  %s804_s27 = sshll.u32 %s877_s23, 4  ;;  %s805_s27 = int_to_ptr.vmem [resolvable:$false] %s804_s27 }
  0x68   : > { %p802_p10 = pnand %p801_p12, %p1144_p0  ;;  %s806_s29 = scalar_lea.vmem %s805_s27, 1024 }
  0x69   : > { %p807_p4 = scmp.lt.s32.totalorder %s1085_s28, %s805_s27  ;;  %p808_p5 = scmp.lt.s32.totalorder %s806_s29, %s800_s26 }
  0x6a   : > { %402 = vmatpush1.bf16.msra.mxu0 %v720_v19  ;;  %443 = vmatpush1.bf16.msra.mxu1 %v721_v20  ;;  %p803_p3 = pneg %p802_p10 }
  0x6b   : > { %403 = vmatprep.subr.bf16.mxu0 %v722_v21  ;;  %444 = vmatprep.subr.bf16.mxu1 %v724_v22  ;;  %p809_p2 = por %p808_p5, %p807_p4 }
  0x6d   : > { %p810_p7 = pnand %p809_p2, %p803_p3 }
  0x6e   : > { %404 = vmatpush1.bf16.msra.mxu0 %v726_v23  ;;  %445 = vmatpush1.bf16.msra.mxu1 %v727_v24 }
  0x6f   : > { %405 = vmatprep.subr.bf16.mxu0 %v728_v25  ;;  %446 = vmatprep.subr.bf16.mxu1 %v730_v26 }
  0x72   : > { %406 = vmatpush1.bf16.msra.mxu0 %v732_v27  ;;  %447 = vmatpush1.bf16.msra.mxu1 %v733_v28 }
  0x73   : > { %407 = vmatprep.subr.bf16.mxu0 %v734_v29  ;;  %448 = vmatprep.subr.bf16.mxu1 %v736_v30 }
  0x76   : > { %408 = vmatpush1.bf16.msra.mxu0 %v738_v31  ;;  %449 = vmatpush1.bf16.msra.mxu1 %v739_v32 }
  0x79   : > { %426 = vmatmul.mubr.bf16.vlgmr.msra.gmra.mrb[0].mxu0 %v200_v33  ;;  %467 = vmatmul.mubr.bf16.vlgmr.msra.gmra.mrb[0].mxu1 %v200_v33 }
 0x14c   : > { %v427_v34 = vpop.f32.mrb[0].mxu0  ;;  %v468_v35 = vpop.f32.mrb[0].mxu1 }
 0x14d   : > { %475 = vst [vmem:[%s198_s17] sm:$0xff] %v427_v34  ;;  %477 = vst [vmem:[%s198_s17 + $0x10] sm:$0xff] %v468_v35  ;;  %v429_v36 = vpop.f32.mrb[1].mxu0  ;;  %v470_v37 = vpop.f32.mrb[1].mxu1 }
 0x14e   : > { %476 = vst [vmem:[%s198_s17 + $0x8] sm:$0xff] %v429_v36  ;;  %478 = vst [vmem:[%s198_s17 + $0x18] sm:$0xff] %v470_v37  ;;  %v431_v38 = vpop.f32.mrb[2].mxu0  ;;  %v472_v39 = vpop.f32.mrb[2].mxu1 }
 0x14f   : > { %v432_v40 = vpop.f32.mrb[3].mxu0  ;;  %v473_v41 = vpop.f32.mrb[3].mxu1 }
 0x150   : > { %813 = shalt.err (!%p810_p7)
}
 0x151   : > { %s814_s6 = scalar_lea.hbm %s1090_s25, 512  ;;  %s818_s16 = scalar_lea.hbm %s1133_s2, 1536 }
 0x152   : > { %p815_p11 = scmp.ne.s32.totalorder %s1090_s25, %s814_s6  ;;  %p819_p13 = scmp.lt.u32.totalorder %s1090_s25, %s1133_s2 }
 0x153   : > { %p820_p9 = scmp.lt.u32.totalorder %s818_s16, %s814_s6  ;;  %p822_p12 = scmp.lt.u32.totalorder %s814_s6, %s1090_s25 }
 0x154   : > { %p816_p8 = pnand %p815_p11, %p1144_p0 }
 0x155   : > { %p821_p6 = por %p820_p9, %p819_p13 }
 0x156   : > { %p817_p1 = pneg %p816_p8 }
 0x157   : > { %p823_p10 = por %p822_p12, %p821_p6 }
 0x159   : > { %p824_p3 = pnand %p823_p10, %p817_p1 }
 0x15b   : > { %827 = shalt.err (!%p824_p3)
}
 0x15c   : > { %642 = dma.vmem_to_hbm [thread:$0]  (%p1144_p0), %s1085_s28, 512, %s1090_s25, %s480_s13  }
 0x15d PF: > { %p656_p4 = scmp.ge.s32.totalorder %s870_s12, 2  ;;  %s506_s5 = sand.u32 1, %s858_s9  }
 0x15e   : > { %p1145_p5 = scmp.ne.s32.totalorder %s1139_s22, 0  ;;  %s507_s8 = scalar_lea.sflag [#allocation4], %s506_s5 }
 0x160   : > { %p652_p2 = pnand %p656_p4, %p1145_p5 }
 0x162   : > { %853 = dma.done.wait (!%p652_p2), %s507_s8, 512  }
 0x163   : > { %855 = vsyncadd (!%p652_p2), %s507_s8, 4294966784  ;;  %p18_p7 = scmp.ge.s32.totalorder %s918_s15, 5   ;;  %s1146_s9 = smov %s862_s10 }
 0x164   : > { %s1147_s10 = smov %s866_s11  ;;  %s1148_s11 = smov %s930_s18 }
 0x165   : > { %s1149_s12 = smov %s918_s15  ;;  %20 = sbr.rel (!%p18_p7) target bundleno = 7 (0x7), region = 86 }
 0x16c   :  { %512 = vsyncpa [#allocation3], 1 }
 0x16d   :  { %514 = vsyncpa [#allocation3 + $0x1], 1 }
 0x16e   :  { %515 = vsyncpa [#allocation6], 1 }
 0x16f   :  { %517 = vsyncpa [#allocation6 + $0x1], 1 }
 0x170   :  { %518 = vsyncpa [#allocation4], 1 }
 0x171   :  { %520 = vsyncpa [#allocation4 + $0x1], 1 }

</bundles_post_ra>
